<compile_context>
chip_gen: v7x
topology: tpu7x:2x2x1
jax: 0.10.0
libtpu: 0.0.40
codegen_flags: <defaults>
</compile_context>

<pallas_src>
import functools
import math

import jax
import jax.numpy as jnp
from jax import lax
from jax.experimental import pallas as pl
from jax.experimental.pallas import tpu as pltpu


_VMEM_LIMIT = 64 * 1024 * 1024  # 64 MiB: explicit raise for v5e/v6e, == v7x physical


# ----------------------------------------------------------------------------
# helpers
# ----------------------------------------------------------------------------
def _round_up(x, m):
    return ((x + m - 1) // m) * m


def _tile_rows(m):
    """Fixed 128/256-row tiles (pad rows instead of divisor-dependent tiles)."""
    if m >= 512:
        return 256
    if m >= 128:
        return 128
    return _round_up(m, 8)


def _heads_per_group(num_heads, head_dim):
    """Heads per attention grid step; aims for a 128-lane output block."""
    gh = max(1, min(num_heads, 128 // max(1, head_dim)))
    while num_heads % gh:
        gh -= 1
    return max(gh, 1)


# ----------------------------------------------------------------------------
# Pallas kernels
# ----------------------------------------------------------------------------
def _dense_kernel(x_ref, w_ref, b_ref, o_ref, *, activation):
    """o = act(x @ W + b).  x:(tm,K) bf16, W:(K,N) bf16, b:(1,N) f32 -> o bf16."""
    y = jnp.dot(x_ref[...], w_ref[...], preferred_element_type=jnp.float32)
    y = y + b_ref[...]
    if activation == "gelu":
        # TODO(synk): HF BERT default is erf-GELU; tanh approximation kept for
        # guaranteed Mosaic lowering (diverges at ~1e-3 level).
        c = math.sqrt(2.0 / math.pi)
        y = 0.5 * y * (1.0 + jnp.tanh(c * (y + 0.044715 * y * y * y)))
    o_ref[...] = y.astype(o_ref.dtype)


def _dense_add_ln_kernel(x_ref, w_ref, b_ref, res_ref, g_ref, beta_ref, o_ref, *, eps):
    """o = LayerNorm((x @ W + b) + residual) * g + beta (fused matmul epilogue)."""
    y = jnp.dot(x_ref[...], w_ref[...], preferred_element_type=jnp.float32)
    y = y + b_ref[...] + res_ref[...].astype(jnp.float32)
    mu = jnp.mean(y, axis=-1, keepdims=True)
    var = jnp.mean((y - mu) * (y - mu), axis=-1, keepdims=True)
    yn = (y - mu) * lax.rsqrt(var + eps)
    o_ref[...] = (yn * g_ref[...] + beta_ref[...]).astype(o_ref.dtype)


def _layernorm_kernel(x_ref, g_ref, b_ref, o_ref, *, eps):
    """LayerNorm over last dim.  x:(tm,D) bf16, g,b:(1,D) f32."""
    x = x_ref[...].astype(jnp.float32)
    mu = jnp.mean(x, axis=-1, keepdims=True)
    var = jnp.mean((x - mu) * (x - mu), axis=-1, keepdims=True)
    y = (x - mu) * lax.rsqrt(var + eps)
    o_ref[...] = (y * g_ref[...] + b_ref[...]).astype(o_ref.dtype)


def _attn_kernel(x_ref, w_ref, b_ref, mask_ref, o_ref, *, heads_per_group, scale):
    """Fused QKV projection + multi-head attention for one (batch, head-group).

    x_ref:    (S, D)        bf16 hidden states of one batch element
    w_ref:    (1, D, 3*gw)  bf16 packed [Qg | Kg | Vg] weight slab for the group
    b_ref:    (1, 1, 3*gw)  f32  packed bias
    mask_ref: (1, 1, S)     f32  additive key mask
    o_ref:    (S, gw)       bf16 context for the gh heads of this group,
                            written as ONE lane-dense block.
    """
    x = x_ref[...]                                            # (S, D) bf16
    w = w_ref[0]                                              # (D, 3*gw) bf16
    qkv = jnp.dot(x, w, preferred_element_type=jnp.float32) + b_ref[0]
    qkv = qkv.astype(jnp.bfloat16)                            # (S, 3*gw)
    gw = qkv.shape[1] // 3
    dh = gw // heads_per_group
    mask = mask_ref[0]                                        # (1, S)
    ctxs = []
    for h in range(heads_per_group):                          # static unrolled loop
        q = qkv[:, h * dh:(h + 1) * dh]
        k = qkv[:, gw + h * dh:gw + (h + 1) * dh]
        v = qkv[:, 2 * gw + h * dh:2 * gw + (h + 1) * dh]
        # scores[i, j] = sum_d q[i, d] * k[j, d]
        s = lax.dot_general(q, k, (((1,), (1,)), ((), ())),
                            preferred_element_type=jnp.float32) * scale
        s = s + mask                                          # (S,S) + (1,S)
        s = s - jnp.max(s, axis=-1, keepdims=True)
        p = jnp.exp(s)
        p = p * pl.reciprocal(jnp.sum(p, axis=-1, keepdims=True), approx=True)
        ctxs.append(jnp.dot(p.astype(jnp.bfloat16), v,
                            preferred_element_type=jnp.float32))
    # single lane-dense store (gw = 128 lanes at real BLIP shapes)
    o_ref[...] = jnp.concatenate(ctxs, axis=-1).astype(o_ref.dtype)


# ----------------------------------------------------------------------------
# Pallas-call wrappers
# ----------------------------------------------------------------------------
def dense(x2d, w, b, tile_m, activation=None):
    M, K = x2d.shape
    N = w.shape[1]
    kernel = functools.partial(_dense_kernel, activation=activation)
    return pl.pallas_call(
        kernel,
        out_shape=jax.ShapeDtypeStruct((M, N), jnp.bfloat16),
        grid=(M // tile_m,),
        in_specs=[
            pl.BlockSpec((tile_m, K), lambda i: (i, 0)),
            pl.BlockSpec((K, N), lambda i: (0, 0), pipeline_mode=pl.Buffered(1)),
            pl.BlockSpec((1, N), lambda i: (0, 0), pipeline_mode=pl.Buffered(1)),
        ],
        out_specs=pl.BlockSpec((tile_m, N), lambda i: (i, 0)),
        compiler_params=pltpu.CompilerParams(
            dimension_semantics=("parallel",), vmem_limit_bytes=_VMEM_LIMIT),
    )(x2d, w, b.reshape(1, N))


def dense_add_layernorm(x2d, w, b, res2d, gamma, beta, tile_m, eps=1e-12):
    """LayerNorm((x2d @ w + b) + res2d) * gamma + beta, fused in one kernel."""
    M, K = x2d.shape
    N = w.shape[1]
    kernel = functools.partial(_dense_add_ln_kernel, eps=eps)
    return pl.pallas_call(
        kernel,
        out_shape=jax.ShapeDtypeStruct((M, N), jnp.bfloat16),
        grid=(M // tile_m,),
        in_specs=[
            pl.BlockSpec((tile_m, K), lambda i: (i, 0)),
            pl.BlockSpec((K, N), lambda i: (0, 0), pipeline_mode=pl.Buffered(1)),
            pl.BlockSpec((1, N), lambda i: (0, 0), pipeline_mode=pl.Buffered(1)),
            pl.BlockSpec((tile_m, N), lambda i: (i, 0)),
            pl.BlockSpec((1, N), lambda i: (0, 0), pipeline_mode=pl.Buffered(1)),
            pl.BlockSpec((1, N), lambda i: (0, 0), pipeline_mode=pl.Buffered(1)),
        ],
        out_specs=pl.BlockSpec((tile_m, N), lambda i: (i, 0)),
        compiler_params=pltpu.CompilerParams(
            dimension_semantics=("parallel",), vmem_limit_bytes=_VMEM_LIMIT),
    )(x2d, w, b.reshape(1, N), res2d, gamma.reshape(1, N), beta.reshape(1, N))


def layernorm(x2d, gamma, beta, tile_m, eps=1e-12):
    M, D = x2d.shape
    kernel = functools.partial(_layernorm_kernel, eps=eps)
    return pl.pallas_call(
        kernel,
        out_shape=jax.ShapeDtypeStruct((M, D), jnp.bfloat16),
        grid=(M // tile_m,),
        in_specs=[
            pl.BlockSpec((tile_m, D), lambda i: (i, 0)),
            pl.BlockSpec((1, D), lambda i: (0, 0), pipeline_mode=pl.Buffered(1)),
            pl.BlockSpec((1, D), lambda i: (0, 0), pipeline_mode=pl.Buffered(1)),
        ],
        out_specs=pl.BlockSpec((tile_m, D), lambda i: (i, 0)),
        compiler_params=pltpu.CompilerParams(
            dimension_semantics=("parallel",), vmem_limit_bytes=_VMEM_LIMIT),
    )(x2d, gamma.reshape(1, D), beta.reshape(1, D))


def fused_qkv_attention(x2d, w_qkv_g, b_qkv_g, mask_add, batch, seq, heads_per_group):
    """x2d: (M_pad, D) bf16 hidden states (rows b*seq .. (b+1)*seq-1 = batch b);
    w_qkv_g: (G, D, 3*gw) bf16 packed per-group QKV weights; b_qkv_g: (G,1,3*gw);
    mask_add: (B, 1, seq) additive key mask.  Returns (M_pad, D) bf16 context."""
    M, D = x2d.shape
    G = w_qkv_g.shape[0]
    gw = w_qkv_g.shape[2] // 3
    dh = gw // heads_per_group
    scale = 1.0 / math.sqrt(dh)
    kernel = functools.partial(_attn_kernel, heads_per_group=heads_per_group,
                               scale=scale)
    return pl.pallas_call(
        kernel,
        out_shape=jax.ShapeDtypeStruct((M, D), jnp.bfloat16),
        grid=(batch, G),
        in_specs=[
            pl.BlockSpec((seq, D), lambda b, g: (b, 0)),
            pl.BlockSpec((1, D, 3 * gw), lambda b, g: (g, 0, 0)),
            pl.BlockSpec((1, 1, 3 * gw), lambda b, g: (g, 0, 0)),
            pl.BlockSpec((1, 1, seq), lambda b, g: (b, 0, 0)),
        ],
        out_specs=pl.BlockSpec((seq, gw), lambda b, g: (b, g)),
        compiler_params=pltpu.CompilerParams(
            dimension_semantics=("parallel", "parallel"),
            vmem_limit_bytes=_VMEM_LIMIT),
    )(x2d, w_qkv_g, b_qkv_g, mask_add)


# ----------------------------------------------------------------------------
# parameters: standard (PyTorch-like) layout + one-time kernel-ready packing
# ----------------------------------------------------------------------------
def init_params(vocab, max_pos, hidden, heads, inter, layers, proj, dtype=jnp.float32):
    """Random f32 parameters in the same layout as the BertModel state dict."""
    key = jax.random.PRNGKey(42)
    keys = iter(jax.random.split(key, 8 + layers * 12))

    def rnd(shape):
        return (0.02 * jax.random.normal(next(keys), shape)).astype(dtype)

    params = {
        "word_emb": rnd((vocab, hidden)),
        "pos_emb": rnd((max_pos, hidden)),
        "type_emb": rnd((2, hidden)),            # BertEmbeddings token_type table
        "emb_ln_g": jnp.ones((hidden,), dtype),
        "emb_ln_b": jnp.zeros((hidden,), dtype),
        "proj_w": rnd((hidden, proj)),
        "proj_b": jnp.zeros((proj,), dtype),
        "layers": [],
    }
    for _ in range(layers):
        params["layers"].append({
            "wq": rnd((hidden, hidden)), "bq": jnp.zeros((hidden,), dtype),
            "wk": rnd((hidden, hidden)), "bk": jnp.zeros((hidden,), dtype),
            "wv": rnd((hidden, hidden)), "bv": jnp.zeros((hidden,), dtype),
            "wo": rnd((hidden, hidden)), "bo": jnp.zeros((hidden,), dtype),
            "ln1_g": jnp.ones((hidden,), dtype), "ln1_b": jnp.zeros((hidden,), dtype),
            "wi": rnd((hidden, inter)), "bi": jnp.zeros((inter,), dtype),
            "wf": rnd((inter, hidden)), "bf": jnp.zeros((hidden,), dtype),
            "ln2_g": jnp.ones((hidden,), dtype), "ln2_b": jnp.zeros((hidden,), dtype),
        })
    return params


def prepare_params(raw, num_heads):
    """One-time HBM prep: cast matmul weights to bf16 and pack Wq/Wk/Wv into
    per-head-group (G, D, 3*gw) slabs for the fused QKV+attention kernel."""
    hidden = raw["word_emb"].shape[1]
    dh = hidden // num_heads
    gh = _heads_per_group(num_heads, dh)
    G = num_heads // gh
    gw = gh * dh

    def pack_w(w):                               # (D, D), head-major cols -> (D, G, gw)
        return w.reshape(hidden, G, gw)

    prepared = {k: v for k, v in raw.items() if k != "layers"}
    prepared["heads_per_group"] = gh
    prepared["layers"] = []
    for lp in raw["layers"]:
        w_qkv = jnp.concatenate(
            [pack_w(lp["wq"]), pack_w(lp["wk"]), pack_w(lp["wv"])], axis=-1)
        w_qkv = jnp.transpose(w_qkv, (1, 0, 2)).astype(jnp.bfloat16)   # (G, D, 3*gw)
        b_qkv = jnp.concatenate(
            [lp["bq"].reshape(G, 1, gw), lp["bk"].reshape(G, 1, gw),
             lp["bv"].reshape(G, 1, gw)], axis=-1).astype(jnp.float32)  # (G, 1, 3*gw)
        prepared["layers"].append({
            "w_qkv_g": w_qkv, "b_qkv_g": b_qkv,
            "wo": lp["wo"].astype(jnp.bfloat16), "bo": lp["bo"].astype(jnp.float32),
            "ln1_g": lp["ln1_g"].astype(jnp.float32), "ln1_b": lp["ln1_b"].astype(jnp.float32),
            "wi": lp["wi"].astype(jnp.bfloat16), "bi": lp["bi"].astype(jnp.float32),
            "wf": lp["wf"].astype(jnp.bfloat16), "bf": lp["bf"].astype(jnp.float32),
            "ln2_g": lp["ln2_g"].astype(jnp.float32), "ln2_b": lp["ln2_b"].astype(jnp.float32),
        })
    return prepared


# ----------------------------------------------------------------------------
# BLIP text encoder (BERT + projection) composed from the kernels above
# ----------------------------------------------------------------------------
def blip_text_encoder_forward(params, input_ids, attention_mask, num_heads):
    B, S = input_ids.shape
    hidden = params["word_emb"].shape[1]
    max_pos = params["pos_emb"].shape[0]
    gh = params["heads_per_group"]
    assert num_heads % gh == 0

    # Pad seq to a multiple of 16 (bf16 sublane packing); padded key positions
    # are masked out and padded query rows are never read for the output.
    S_pad = _round_up(S, 16)
    assert S_pad <= max_pos, "padded sequence exceeds max_position_embeddings"
    if S_pad != S:
        input_ids = jnp.pad(input_ids, ((0, 0), (0, S_pad - S)))
        attention_mask = jnp.pad(attention_mask, ((0, 0), (0, S_pad - S)))

    M0 = B * S_pad
    tm = _tile_rows(M0)            # fixed 128/256-row tiles at real shapes
    M_pad = _round_up(M0, tm)

    # --- embeddings (gather/broadcast adds are glue; LN runs in a Pallas kernel)
    word = jnp.take(params["word_emb"], input_ids, axis=0)             # (B,Sp,D)
    pos = params["pos_emb"][:S_pad][None]                              # (1,Sp,D)
    tok = params["type_emb"][0][None, None]                            # token_type_ids == 0
    x2d = (word + pos + tok).reshape(M0, hidden).astype(jnp.bfloat16)
    if M_pad != M0:
        x2d = jnp.pad(x2d, ((0, M_pad - M0), (0, 0)))                  # pad rows once
    x2d = layernorm(x2d, params["emb_ln_g"], params["emb_ln_b"], tm)

    # additive key mask: 0 where attended, -10000 where padded (HF convention)
    mask_add = ((1.0 - attention_mask.astype(jnp.float32)) * -10000.0).reshape(B, 1, S_pad)

    for lp in params["layers"]:
        # self-attention with the QKV projection fused into the kernel
        ctx = fused_qkv_attention(x2d, lp["w_qkv_g"], lp["b_qkv_g"], mask_add,
                                  B, S_pad, gh)                        # (M_pad, D)
        # output projection fused with residual-add + LayerNorm
        x2d = dense_add_layernorm(ctx, lp["wo"], lp["bo"], x2d,
                                  lp["ln1_g"], lp["ln1_b"], tm)
        # feed-forward: GELU matmul, then down-proj fused with residual + LN
        inter = dense(x2d, lp["wi"], lp["bi"], tm, activation="gelu")  # (M_pad, 4D)
        x2d = dense_add_layernorm(inter, lp["wf"], lp["bf"], x2d,
                                  lp["ln2_g"], lp["ln2_b"], tm)

    cls = x2d[:M0].reshape(B, S_pad, hidden)[:, 0, :].astype(jnp.float32)   # [CLS]
    # Final (B, D) x (D, proj) projection is far below pallas_call fixed
    # overhead -> leave it to XLA's fused GEMM.
    return cls @ params["proj_w"] + params["proj_b"]


# ----------------------------------------------------------------------------
if __name__ == "__main__":
    # small synthetic config (real BLIP: hidden=768, 12 heads, 12 layers, proj=256)
    VOCAB, MAX_POS = 64, 16
    HIDDEN, HEADS, INTER, LAYERS, PROJ = 32, 4, 64, 2, 16
    B, S = 2, 8

    raw = init_params(VOCAB, MAX_POS, HIDDEN, HEADS, INTER, LAYERS, PROJ)
    params = prepare_params(raw, HEADS)

    key = jax.random.PRNGKey(0)
    k_ids, _ = jax.random.split(key)
    input_ids = jax.random.randint(k_ids, (B, S), 0, VOCAB, dtype=jnp.int32)
    lengths = jnp.array([S, 5], dtype=jnp.int32)
    attention_mask = (jnp.arange(S)[None, :] < lengths[:, None]).astype(jnp.int32)

    out = blip_text_encoder_forward(params, input_ids, attention_mask, HEADS)
    out = jax.block_until_ready(out)
    assert out.shape == (B, PROJ) and out.dtype == jnp.float32
    print("KERNEL_OK")
</pallas_src>

<mosaic_0001>
module attributes {stable_mosaic.version = 11 : i64} {
  func.func @_layernorm_kernel(%arg0: i32, %arg1: memref<32x32xbf16, #tpu.memory_space<vmem>>, %arg2: memref<1x32xf32, #tpu.memory_space<vmem>>, %arg3: memref<1x32xf32, #tpu.memory_space<vmem>>, %arg4: memref<32x32xbf16, #tpu.memory_space<vmem>>) attributes {dimension_semantics = [#tpu.dimension_semantics<parallel>], iteration_bounds = array<i64: 1>, scalar_prefetch = 0 : i64, scratch_operands = 0 : i64, tpu.core_type = #tpu.core_type<tc>, window_params = [{transform_indices = @transform_0, window_bounds = array<i64: 32, 32>}, {pipeline_mode = #tpu.pipeline_mode<synchronous>, transform_indices = @transform_1, window_bounds = array<i64: 1, 32>}, {pipeline_mode = #tpu.pipeline_mode<synchronous>, transform_indices = @transform_2, window_bounds = array<i64: 1, 32>}, {transform_indices = @transform_3, window_bounds = array<i64: 32, 32>}]} {
    %c0 = arith.constant 0 : index
    %c0_0 = arith.constant 0 : index
    %0 = vector.load %arg1[%c0, %c0_0] : memref<32x32xbf16, #tpu.memory_space<vmem>>, vector<32x32xbf16>
    %1 = arith.extf %0 : vector<32x32xbf16> to vector<32x32xf32>
    %cst = arith.constant dense<0.000000e+00> : vector<32xf32>
    %2 = vector.multi_reduction <add>, %1, %cst [1] : vector<32x32xf32> to vector<32xf32>
    %3 = vector.shape_cast %2 : vector<32xf32> to vector<32x1xf32>
    %cst_1 = arith.constant 3.200000e+01 : f32
    %4 = vector.broadcast %cst_1 : f32 to vector<32x1xf32>
    %5 = arith.divf %3, %4 : vector<32x1xf32>
    %6 = vector.broadcast %5 : vector<32x1xf32> to vector<32x32xf32>
    %7 = arith.subf %1, %6 : vector<32x32xf32>
    %8 = vector.broadcast %5 : vector<32x1xf32> to vector<32x32xf32>
    %9 = arith.subf %1, %8 : vector<32x32xf32>
    %10 = arith.mulf %7, %9 : vector<32x32xf32>
    %cst_2 = arith.constant dense<0.000000e+00> : vector<32xf32>
    %11 = vector.multi_reduction <add>, %10, %cst_2 [1] : vector<32x32xf32> to vector<32xf32>
    %12 = vector.shape_cast %11 : vector<32xf32> to vector<32x1xf32>
    %cst_3 = arith.constant 3.200000e+01 : f32
    %13 = vector.broadcast %cst_3 : f32 to vector<32x1xf32>
    %14 = arith.divf %12, %13 : vector<32x1xf32>
    %15 = vector.broadcast %5 : vector<32x1xf32> to vector<32x32xf32>
    %16 = arith.subf %1, %15 : vector<32x32xf32>
    %cst_4 = arith.constant 9.99999996E-13 : f32
    %17 = vector.broadcast %cst_4 : f32 to vector<32x1xf32>
    %18 = arith.addf %14, %17 : vector<32x1xf32>
    %19 = math.rsqrt %18 : vector<32x1xf32>
    %20 = vector.broadcast %19 : vector<32x1xf32> to vector<32x32xf32>
    %21 = arith.mulf %16, %20 : vector<32x32xf32>
    %c0_5 = arith.constant 0 : index
    %c0_6 = arith.constant 0 : index
    %22 = vector.load %arg2[%c0_5, %c0_6] : memref<1x32xf32, #tpu.memory_space<vmem>>, vector<1x32xf32>
    %23 = vector.broadcast %22 : vector<1x32xf32> to vector<32x32xf32>
    %24 = arith.mulf %21, %23 : vector<32x32xf32>
    %c0_7 = arith.constant 0 : index
    %c0_8 = arith.constant 0 : index
    %25 = vector.load %arg3[%c0_7, %c0_8] : memref<1x32xf32, #tpu.memory_space<vmem>>, vector<1x32xf32>
    %26 = vector.broadcast %25 : vector<1x32xf32> to vector<32x32xf32>
    %27 = arith.addf %24, %26 : vector<32x32xf32>
    %28 = arith.truncf %27 : vector<32x32xf32> to vector<32x32xbf16>
    %c0_9 = arith.constant 0 : index
    %c0_10 = arith.constant 0 : index
    %29 = vector.load %arg4[%c0_9, %c0_10] : memref<32x32xbf16, #tpu.memory_space<vmem>>, vector<32x32xbf16>
    tpu.vector_store %arg4[%c0_9, %c0_10], %28 {strides = array<i32>} : memref<32x32xbf16, #tpu.memory_space<vmem>>, vector<32x32xbf16>,
    return
  }
  func.func @transform_0(%arg0: i32) -> (i32, i32) {
    %c0_i32 = arith.constant 0 : i32
    %c0_i32_0 = arith.constant 0 : i32
    return %arg0, %c0_i32 : i32, i32
  }
  func.func @transform_1(%arg0: i32) -> (i32, i32) {
    %c0_i32 = arith.constant 0 : i32
    %c0_i32_0 = arith.constant 0 : i32
    %c0_i32_1 = arith.constant 0 : i32
    return %c0_i32, %c0_i32_0 : i32, i32
  }
  func.func @transform_2(%arg0: i32) -> (i32, i32) {
    %c0_i32 = arith.constant 0 : i32
    %c0_i32_0 = arith.constant 0 : i32
    %c0_i32_1 = arith.constant 0 : i32
    return %c0_i32, %c0_i32_0 : i32, i32
  }
  func.func @transform_3(%arg0: i32) -> (i32, i32) {
    %c0_i32 = arith.constant 0 : i32
    %c0_i32_0 = arith.constant 0 : i32
    return %arg0, %c0_i32 : i32, i32
  }
}

</mosaic_0001>

<bundles_post_ra>
// kernel: tpu_custom_call.1
= control target key start
LH: loop header
LB: loop body
LE: loop exit
PB: predicated region body
PF: predicated region fallthrough
CT: control target
= control target key end

     0   :  { %8 = vsyncpa [#allocation3], 0  ;;  %s401_s0 = inlined_call_operand.hbm [shape: bf16[32,32], index: 0, kind: input, shape index: {}]   ;;  %s402_s1 = inlined_call_operand.hbm [shape: f32[1,32], index: 1, kind: input, shape index: {}]   ;;  %s403_s2 = inlined_call_operand.hbm [shape: f32[1,32], index: 2, kind: input, shape index: {}]   ;;  %s404_s3 = inlined_call_operand.hbm [shape: bf16[32,32], index: 3, kind: output, shape index: {}]  }
   0x1   :  { %9 = vsyncpa [#allocation6], 0 }
   0x2   :  { %10 = vsyncpa [#allocation4], 0  ;;  %s302_s12 = smov [#allocation5]   ;;  %s303_s14 = smov [#allocation2]  }
   0x3   :  { %s29_s13 = sshll.u32 %s302_s12, 4  ;;  %s16_s15 = sshll.u32 %s303_s14, 4  ;;  %s30_s13 = int_to_ptr.vmem [resolvable:$true] %s29_s13  ;;  %s328_s15 = int_to_ptr.vmem [resolvable:$true] %s16_s15 }
   0x4   :  { %s208_s18 = scalar_lea.hbm %s402_s1, 16 }
   0x5   :  { %p209_p0 = scmp.ne.s32.totalorder %s402_s1, %s208_s18  ;;  %p212_p1 = scmp.lt.u32.totalorder %s208_s18, %s402_s1 }
   0x7   :  { %p214_p2 = pnand %p212_p1, %p209_p0 }
   0x9   :  { %217 = shalt.err (!%p214_p2)
}
   0xa   :  { %s218_s23 = scalar_lea.vmem %s30_s13, 16  ;;  %s222_s24 = scalar_lea.vmem %s30_s13, 32 }
   0xb   :  { %p219_p3 = scmp.ne.s32.totalorder %s30_s13, %s218_s23  ;;  %p223_p4 = scmp.lt.s32.totalorder %s30_s13, %s30_s13 }
   0xc   :  { %p224_p5 = scmp.lt.s32.totalorder %s222_s24, %s218_s23 }
   0xe   :  { %p225_p6 = por %p224_p5, %p223_p4 }
  0x10   :  { %p226_p7 = pnand %p225_p6, %p219_p3 }
  0x12   :  { %229 = shalt.err (!%p226_p7)
}
  0x13   :  { %32 = dma.hbm_to_vmem [thread:$0]  %s402_s1, 16, %s30_s13, [#allocation6]  }
  0x14   :  { %s230_s29 = scalar_lea.hbm %s401_s0, 256 }
  0x15   :  { %p231_p8 = scmp.ne.s32.totalorder %s401_s0, %s230_s29  ;;  %p234_p9 = scmp.lt.u32.totalorder %s230_s29, %s401_s0 }
  0x17   :  { %p236_p10 = pnand %p234_p9, %p231_p8 }
  0x19   :  { %239 = shalt.err (!%p236_p10)
}
  0x1a   :  { %s240_s7 = scalar_lea.vmem %s328_s15, 256  ;;  %p245_p12 = scmp.lt.s32.totalorder %s328_s15, %s328_s15 }
  0x1b   :  { %p241_p11 = scmp.ne.s32.totalorder %s328_s15, %s240_s7  ;;  %p246_p13 = scmp.lt.s32.totalorder %s240_s7, %s240_s7 }
  0x1d   :  { %p247_p0 = por %p246_p13, %p245_p12 }
  0x1f   :  { %p248_p1 = pnand %p247_p0, %p241_p11 }
  0x21   :  { %251 = shalt.err (!%p248_p1)
}
  0x22   :  { %s304_s1 = smov 64   ;;  %s305_s8 = smov 4  }
  0x23   :  { %22 = dma.hbm_to_vmem [thread:$0]  %s401_s0, 256, %s328_s15, [#allocation3], %s304_s1, %s304_s1, %s305_s8  }
  0x24   :  { %s306_s11 = smov [#allocation7]   ;;  %s252_s16 = scalar_lea.hbm %s403_s2, 16 }
  0x25   :  { %s39_s12 = sshll.u32 %s306_s11, 4  ;;  %p253_p2 = scmp.ne.s32.totalorder %s403_s2, %s252_s16  ;;  %s40_s12 = int_to_ptr.vmem [resolvable:$true] %s39_s12 }
  0x26   :  { %p256_p3 = scmp.lt.u32.totalorder %s252_s16, %s403_s2 }
  0x28   :  { %p258_p4 = pnand %p256_p3, %p253_p2 }
  0x2a   :  { %261 = shalt.err (!%p258_p4)
}
  0x2b   :  { %s262_s21 = scalar_lea.vmem %s40_s12, 16  ;;  %s266_s0 = scalar_lea.vmem %s40_s12, 32 }
  0x2c   :  { %p263_p5 = scmp.ne.s32.totalorder %s40_s12, %s262_s21  ;;  %p267_p6 = scmp.lt.s32.totalorder %s40_s12, %s40_s12 }
  0x2d   :  { %p268_p7 = scmp.lt.s32.totalorder %s266_s0, %s262_s21 }
  0x2f   :  { %p269_p8 = por %p268_p7, %p267_p6 }
  0x31   :  { %p270_p9 = pnand %p269_p8, %p263_p5 }
  0x33   :  { %273 = shalt.err (!%p270_p9)
}
  0x34   :  { %42 = dma.hbm_to_vmem [thread:$0]  %s403_s2, 16, %s40_s12, [#allocation6]  }
  0x35   :  { %296 = dma.done.wait [#allocation3], 256  }
  0x36   :  { %297 = vsyncadd [#allocation3], 4294967040 }
  0x37   :  { %298 = dma.done.wait [#allocation6], 32  }
  0x38   :  { %299 = vsyncadd [#allocation6], 4294967264  ;;  %v186_v0 = vld [vmem:[#allocation2] sm:$0xff]   ;;  %vm60_vm0 = vcmask 261120   ;;  %v193_v1 = vld [vmem:[#allocation2 + $0x8] sm:$0xff]   ;;  %vm152_vm1 = vcmask 257024  }
  0x39   :  { %v187_v2 = vunpack.c.l.bf16 %v186_v0  ;;  %v191_v3 = vunpack.c.l.bf16 %v193_v1  ;;  %v188_v4 = vunpack.c.h.bf16 %v186_v0  ;;  %v192_v5 = vunpack.c.h.bf16 %v193_v1  ;;  %v175_v43 = vld [vmem:[#allocation5] ss:$0 sm:$0xff]  ;;  %v176_v45 = vld [vmem:[#allocation7] ss:$0 sm:$0xff]  ;;  %s307_s2 = smov [#allocation8]  }
  0x3a   :  { %s162_s23 = sshll.u32 %s307_s2, 4  ;;  %s163_s23 = int_to_ptr.vmem [resolvable:$true] %s162_s23 }
  0x3b   :  { %v61_v6 = vsel %vm60_vm0, %v187_v2, 0.0  ;;  %v67_v7 = vsel %vm60_vm0, %v191_v3, 0.0  ;;  %v64_v8 = vsel %vm60_vm0, %v188_v4, 0.0  ;;  %v70_v9 = vsel %vm60_vm0, %v192_v5, 0.0  ;;  %s274_s24 = scalar_lea.vmem %s163_s23, 256  ;;  %p279_p11 = scmp.lt.s32.totalorder %s163_s23, %s163_s23 }
  0x3c   :  { %62 = vadd.xlane.f32.xlu0 %v61_v6  ;;  %68 = vadd.xlane.f32.xlu1 %v67_v7  ;;  %p275_p10 = scmp.ne.s32.totalorder %s163_s23, %s274_s24  ;;  %p280_p12 = scmp.lt.s32.totalorder %s274_s24, %s274_s24 }
  0x3e   :  { %p281_p13 = por %p280_p12, %p279_p11 }
  0x40   :  { %65 = vadd.xlane.f32.xlu0 %v64_v8  ;;  %71 = vadd.xlane.f32.xlu1 %v70_v9  ;;  %p282_p0 = pnand %p281_p13, %p275_p10 }
  0xc9   :  { %v63_v10 = vpop.xlane.xlu0 %62  ;;  %v69_v11 = vpop.xlane.xlu1 %68 }
  0xca   :  { %v74_v12 = vmul.f32 0.03125, %v63_v10  ;;  %v76_v13 = vmul.f32 0.03125, %v69_v11 }
  0xcc   :  { %v78_v14 = vsub.f32 %v187_v2, %v74_v12  ;;  %v80_v15 = vsub.f32 %v191_v3, %v76_v13 }
  0xcd   :  { %v66_v16 = vpop.xlane.xlu0 %65  ;;  %v72_v17 = vpop.xlane.xlu1 %71 }
  0xce   :  { %v75_v18 = vmul.f32 0.03125, %v66_v16  ;;  %v77_v19 = vmul.f32 0.03125, %v72_v17  ;;  %v82_v20 = vmul.f32 %v78_v14, %v78_v14  ;;  %v84_v21 = vmul.f32 %v80_v15, %v80_v15 }
  0xd0   :  { %v79_v22 = vsub.f32 %v188_v4, %v75_v18  ;;  %v81_v23 = vsub.f32 %v192_v5, %v77_v19  ;;  %v86_v24 = vsel %vm60_vm0, %v82_v20, 0.0  ;;  %v92_v25 = vsel %vm60_vm0, %v84_v21, 0.0 }
  0xd1   :  { %87 = vadd.xlane.f32.xlu0 %v86_v24 }
  0xd2   :  { %v83_v26 = vmul.f32 %v79_v22, %v79_v22  ;;  %v85_v27 = vmul.f32 %v81_v23, %v81_v23 }
  0xd4   :  { %v89_v28 = vsel %vm60_vm0, %v83_v26, 0.0  ;;  %v95_v29 = vsel %vm60_vm0, %v85_v27, 0.0 }
  0xd5   :  { %93 = vadd.xlane.f32.xlu0 %v92_v25  ;;  %90 = vadd.xlane.f32.xlu1 %v89_v28 }
  0xd9   :  { %96 = vadd.xlane.f32.xlu1 %v95_v29 }
 0x15e   :  { %v88_v30 = vpop.xlane.xlu0 %87 }
 0x15f   :  { %v98_v31 = vmul.f32 0.03125, %v88_v30 }
 0x161   :  { %v102_v32 = vadd.f32 1e-12, %v98_v31 }
 0x162   :  { %v91_v33 = vpop.xlane.xlu1 %90  ;;  %v94_v34 = vpop.xlane.xlu0 %93 }
 0x163   :  { %200 = vrsqrt.f32 %v102_v32  ;;  %v99_v35 = vmul.f32 0.03125, %v91_v33  ;;  %v100_v36 = vmul.f32 0.03125, %v94_v34 }
 0x165   :  { %v103_v37 = vadd.f32 1e-12, %v99_v35  ;;  %v104_v38 = vadd.f32 1e-12, %v100_v36 }
 0x166   :  { %v97_v39 = vpop.xlane.xlu1 %96 }
 0x167   :  { %202 = vrsqrt.f32 %v103_v37  ;;  %v101_v40 = vmul.f32 0.03125, %v97_v39 }
 0x168   :  { %204 = vrsqrt.f32 %v104_v38 }
 0x169   :  { %v105_v41 = vadd.f32 1e-12, %v101_v40 }
 0x16b   :  { %206 = vrsqrt.f32 %v105_v41 }
 0x16d   :  { %v201_v42 = vpop.eup %200 }
 0x16e   :  { %v110_v44 = vmul.f32 %v201_v42, %v78_v14 }
 0x170   :  { %v121_v46 = vmul.f32 %v175_v43, %v110_v44 }
 0x171   :  { %v203_v47 = vpop.eup %202 }
 0x172   :  { %v205_v48 = vpop.eup %204  ;;  %v111_v49 = vmul.f32 %v203_v47, %v79_v22  ;;  %v132_v50 = vadd.f32 %v176_v45, %v121_v46 }
 0x173   :  { %v112_v51 = vmul.f32 %v205_v48, %v80_v15 }
 0x174   :  { %v122_v52 = vmul.f32 %v175_v43, %v111_v49  ;;  %v181_v53 = vpack.c.bf16 %v132_v50, %v132_v50 }
 0x175   :  { %v207_v54 = vpop.eup %206  ;;  %v123_v55 = vmul.f32 %v175_v43, %v112_v51 }
 0x176   :  { %v113_v56 = vmul.f32 %v207_v54, %v81_v23  ;;  %v133_v57 = vadd.f32 %v176_v45, %v122_v52  ;;  %153 = vst.msk [vmem:[#allocation8] sm:$0xf] %vm152_vm1, %v181_v53 }
 0x177   :  { %v134_v58 = vadd.f32 %v176_v45, %v123_v55 }
 0x178   :  { %v124_v59 = vmul.f32 %v175_v43, %v113_v56  ;;  %v182_v60 = vpack.c.bf16 %v133_v57, %v133_v57 }
 0x179   :  { %v183_v61 = vpack.c.bf16 %v134_v58, %v134_v58 }
 0x17a   :  { %v135_v62 = vadd.f32 %v176_v45, %v124_v59  ;;  %154 = vst.msk [vmem:[#allocation8 + $0x4] sm:$0xf] %vm152_vm1, %v182_v60 }
 0x17b   :  { %155 = vst.msk [vmem:[#allocation8 + $0x8] sm:$0xf] %vm152_vm1, %v183_v61 }
 0x17c   :  { %v184_v63 = vpack.c.bf16 %v135_v62, %v135_v62 }
 0x17e   :  { %156 = vst.msk [vmem:[#allocation8 + $0xc] sm:$0xf] %vm152_vm1, %v184_v63 }
 0x17f   :  { %285 = shalt.err (!%p282_p0)
}
 0x180   :  { %s286_s27 = scalar_lea.hbm %s404_s3, 256 }
 0x181   :  { %p287_p1 = scmp.ne.s32.totalorder %s404_s3, %s286_s27  ;;  %p290_p2 = scmp.lt.u32.totalorder %s286_s27, %s404_s3 }
 0x183   :  { %p292_p3 = pnand %p290_p2, %p287_p1 }
 0x185   :  { %295 = shalt.err (!%p292_p3)
}
 0x186   :  { %168 = dma.vmem_to_hbm [thread:$0]  %s163_s23, 256, %s404_s3, [#allocation4], %s304_s1, %s304_s1, %s305_s8  }
 0x187   :  { %300 = dma.done.wait [#allocation4], 256  }
 0x188   :  { %301 = vsyncadd [#allocation4], 4294967040 }
 0x189   :  { %172 = vsyncpa [#allocation3], 1 }
 0x18a   :  { %173 = vsyncpa [#allocation6], 1 }
 0x18b   :  { %174 = vsyncpa [#allocation4], 1 }

</bundles_post_ra>
